<compile_context>
chip_gen: v7x
topology: tpu7x:2x2x1
jax: 0.10.0
libtpu: 0.0.40
codegen_flags: <defaults>
</compile_context>

<pallas_src>
import jax
import jax.numpy as jnp
from jax.experimental import pallas as pl
from jax.experimental.pallas import tpu as pltpu


def _round_up(x, m):
    return ((x + m - 1) // m) * m


def embedding_head_kernel(x_ref, w_ref, b_ref, o_ref):
    """Fused global-avg-pool + flatten + Linear(512 -> 256).

    x_ref: (TILE_B, HW, C) f32 layer4 features, channels-last (lane-dense in C).
    w_ref: (C, OUT) bf16 -- fc weight^T with the 1/(H*W) pool scale pre-folded.
    b_ref: (1, OUT) f32 fc bias.
    o_ref: (TILE_B, OUT) f32 output embedding.
    """
    # Sum over the spatial axis; the 1/(H*W) mean factor is folded into w.
    pooled = jnp.sum(x_ref[...], axis=1)                      # (TILE_B, C) f32
    # Weight travels over HBM as bf16 (half the bytes); upcast once for the MXU.
    w = w_ref[...].astype(jnp.float32)                        # (C, OUT) f32
    out = jnp.dot(pooled, w, preferred_element_type=jnp.float32) + b_ref[...]
    o_ref[...] = out.astype(o_ref.dtype)


def embedding_net_forward(feat_nchw, params):
    """feat_nchw: (B, C, H, W) f32 layer4 features. Returns (B, 256) f32."""
    B, C, H, W = feat_nchw.shape
    HW = H * W
    OUT = params["b_fc"].shape[-1]

    # Wrapper-side layout plumbing: NCHW -> (B, H*W, C), lane-dense in C=512.
    x = jnp.transpose(feat_nchw.reshape(B, C, HW), (0, 2, 1))

    # Batch tile: shard large batches across the grid (parallel -> megacore on
    # v7x); pad small/odd batches up to a sublane-friendly multiple of 8.
    tile_b = 128 if B >= 128 else _round_up(B, 8)
    b_pad = _round_up(B, tile_b)
    if b_pad != B:
        x = jnp.pad(x, ((0, b_pad - B), (0, 0), (0, 0)))

    out = pl.pallas_call(
        embedding_head_kernel,
        out_shape=jax.ShapeDtypeStruct((b_pad, OUT), jnp.float32),
        grid_spec=pltpu.PrefetchScalarGridSpec(
            num_scalar_prefetch=0,
            grid=(b_pad // tile_b,),
            in_specs=[
                pl.BlockSpec((tile_b, HW, C), lambda i: (i, 0, 0)),
                pl.BlockSpec((C, OUT), lambda i: (0, 0)),
                pl.BlockSpec((1, OUT), lambda i: (0, 0)),
            ],
            out_specs=pl.BlockSpec((tile_b, OUT), lambda i: (i, 0)),
        ),
        compiler_params=pltpu.CompilerParams(
            dimension_semantics=("parallel",),
        ),
    )(x, params["w_fc"], params["b_fc"])
    return out[:B]


def init_params(key, in_features, out_features, hw):
    """Deterministic fc params (PyTorch nn.Linear-style uniform init).

    Returns (kernel_params, ref_params): the kernel copy has the 1/(H*W)
    avg-pool scale folded into the weight and is stored in bf16.
    """
    kw, kb = jax.random.split(key)
    bound = 1.0 / jnp.sqrt(in_features)
    w = jax.random.uniform(kw, (in_features, out_features), jnp.float32, -bound, bound)
    b = jax.random.uniform(kb, (1, out_features), jnp.float32, -bound, bound)

    kernel_params = dict(
        w_fc=(w / float(hw)).astype(jnp.bfloat16),  # fold pool scale, ship bf16
        b_fc=b,
    )
    ref_params = dict(w_fc_f32=w, b_fc=b)
    return kernel_params, ref_params


def reference_forward(feat_nchw, ref_params):
    """Pure-JAX reference: avg-pool -> flatten -> fc (f32 throughout)."""
    pooled = jnp.mean(feat_nchw, axis=(2, 3))                 # (B, 512)
    return pooled @ ref_params["w_fc_f32"] + ref_params["b_fc"]


if __name__ == "__main__":
    # Small shapes consistent with the module: resnet18 layer4 features for a
    # 64x64 input image -> (B, 512, 2, 2); fc: Linear(512, 256).
    B, C, H, W = 8, 512, 2, 2
    OUT = 256

    key = jax.random.PRNGKey(0)
    kx, kp = jax.random.split(key)
    feat = jax.random.normal(kx, (B, C, H, W), jnp.float32)
    params, ref_params = init_params(kp, C, OUT, H * W)

    out = embedding_net_forward(feat, params)
    out = jax.block_until_ready(out)

    ref = reference_forward(feat, ref_params)
    assert out.shape == (B, OUT)
    # bf16 weight storage bounds the deviation from the f32 reference well
    # inside 1e-2 at these magnitudes.
    assert jnp.allclose(out, ref, atol=1e-2, rtol=1e-2), float(jnp.max(jnp.abs(out - ref)))

    print("KERNEL_OK")
</pallas_src>

<mosaic_0001>
module attributes {stable_mosaic.version = 11 : i64} {
  func.func @embedding_head_kernel(%arg0: i32, %arg1: memref<8x4x512xf32, #tpu.memory_space<vmem>>, %arg2: memref<512x256xbf16, #tpu.memory_space<vmem>>, %arg3: memref<1x256xf32, #tpu.memory_space<vmem>>, %arg4: memref<8x256xf32, #tpu.memory_space<vmem>>) attributes {dimension_semantics = [#tpu.dimension_semantics<parallel>], iteration_bounds = array<i64: 1>, scalar_prefetch = 0 : i64, scratch_operands = 0 : i64, tpu.core_type = #tpu.core_type<tc>, window_params = [{transform_indices = @transform_0, window_bounds = array<i64: 8, 4, 512>}, {pipeline_mode = #tpu.pipeline_mode<synchronous>, transform_indices = @transform_1, window_bounds = array<i64: 512, 256>}, {pipeline_mode = #tpu.pipeline_mode<synchronous>, transform_indices = @transform_2, window_bounds = array<i64: 1, 256>}, {transform_indices = @transform_3, window_bounds = array<i64: 8, 256>}]} {
    %c0 = arith.constant 0 : index
    %c0_0 = arith.constant 0 : index
    %c0_1 = arith.constant 0 : index
    %0 = vector.load %arg1[%c0, %c0_0, %c0_1] : memref<8x4x512xf32, #tpu.memory_space<vmem>>, vector<8x4x512xf32>
    %cst = arith.constant dense<0.000000e+00> : vector<8x512xf32>
    %1 = vector.multi_reduction <add>, %0, %cst [1] : vector<8x4x512xf32> to vector<8x512xf32>
    %c0_2 = arith.constant 0 : index
    %c0_3 = arith.constant 0 : index
    %2 = vector.load %arg2[%c0_2, %c0_3] : memref<512x256xbf16, #tpu.memory_space<vmem>>, vector<512x256xbf16>
    %3 = arith.extf %2 : vector<512x256xbf16> to vector<512x256xf32>
    %cst_4 = arith.constant dense<0.000000e+00> : vector<8x256xf32>
    %4 = tpu.matmul %1, %3, %cst_4 {dimension_numbers = #tpu.dot_dimension_numbers<[1], [0], [0], [1], [0, 0, 1, 1], [], []>} : vector<8x512xf32>, vector<512x256xf32>, vector<8x256xf32> -> vector<8x256xf32>
    %c0_5 = arith.constant 0 : index
    %c0_6 = arith.constant 0 : index
    %5 = vector.load %arg3[%c0_5, %c0_6] : memref<1x256xf32, #tpu.memory_space<vmem>>, vector<1x256xf32>
    %6 = vector.broadcast %5 : vector<1x256xf32> to vector<8x256xf32>
    %7 = arith.addf %4, %6 : vector<8x256xf32>
    %c0_7 = arith.constant 0 : index
    %c0_8 = arith.constant 0 : index
    %8 = vector.load %arg4[%c0_7, %c0_8] : memref<8x256xf32, #tpu.memory_space<vmem>>, vector<8x256xf32>
    tpu.vector_store %arg4[%c0_7, %c0_8], %7 {strides = array<i32>} : memref<8x256xf32, #tpu.memory_space<vmem>>, vector<8x256xf32>,
    return
  }
  func.func @transform_0(%arg0: i32) -> (i32, i32, i32) {
    %c0_i32 = arith.constant 0 : i32
    %c0_i32_0 = arith.constant 0 : i32
    %c0_i32_1 = arith.constant 0 : i32
    return %arg0, %c0_i32, %c0_i32_0 : i32, i32, i32
  }
  func.func @transform_1(%arg0: i32) -> (i32, i32) {
    %c0_i32 = arith.constant 0 : i32
    %c0_i32_0 = arith.constant 0 : i32
    %c0_i32_1 = arith.constant 0 : i32
    return %c0_i32, %c0_i32_0 : i32, i32
  }
  func.func @transform_2(%arg0: i32) -> (i32, i32) {
    %c0_i32 = arith.constant 0 : i32
    %c0_i32_0 = arith.constant 0 : i32
    %c0_i32_1 = arith.constant 0 : i32
    return %c0_i32, %c0_i32_0 : i32, i32
  }
  func.func @transform_3(%arg0: i32) -> (i32, i32) {
    %c0_i32 = arith.constant 0 : i32
    %c0_i32_0 = arith.constant 0 : i32
    return %arg0, %c0_i32 : i32, i32
  }
}

</mosaic_0001>

<bundles_post_ra>
// kernel: tpu_custom_call.1
= control target key start
LH: loop header
LB: loop body
LE: loop exit
PB: predicated region body
PF: predicated region fallthrough
CT: control target
= control target key end

     0   :  { %8 = vsyncpa [#allocation3], 0  ;;  %s1361_s0 = inlined_call_operand.hbm [shape: f32[8,4,512], index: 0, kind: input, shape index: {}]   ;;  %s1362_s1 = inlined_call_operand.hbm [shape: bf16[512,256], index: 1, kind: input, shape index: {}]   ;;  %s1363_s2 = inlined_call_operand.vmem [shape: f32[1,256], index: 2, kind: input, shape index: {}]   ;;  %s1364_s3 = inlined_call_operand.hbm [shape: f32[8,256], index: 3, kind: output, shape index: {}]  }
   0x1   :  { %9 = vsyncpa [#allocation6], 0 }
   0x2   :  { %10 = vsyncpa [#allocation4], 0  ;;  %s1154_s12 = smov [#allocation2]   ;;  %s1082_s16 = scalar_lea.hbm %s1361_s0, 2048 }
   0x3   :  { %s16_s13 = sshll.u32 %s1154_s12, 4  ;;  %p1083_p0 = scmp.ne.s32.totalorder %s1361_s0, %s1082_s16  ;;  %s17_s13 = int_to_ptr.vmem [resolvable:$true] %s16_s13 }
   0x4   :  { %p1086_p1 = scmp.lt.u32.totalorder %s1082_s16, %s1361_s0 }
   0x6   :  { %p1088_p2 = pnand %p1086_p1, %p1083_p0 }
   0x8   :  { %1091 = shalt.err (!%p1088_p2)
}
   0x9   :  { %s1092_s21 = scalar_lea.vmem %s17_s13, 2048  ;;  %p1097_p4 = scmp.lt.s32.totalorder %s17_s13, %s17_s13 }
   0xa   :  { %p1093_p3 = scmp.ne.s32.totalorder %s17_s13, %s1092_s21  ;;  %p1098_p5 = scmp.lt.s32.totalorder %s1092_s21, %s1092_s21 }
   0xc   :  { %p1099_p6 = por %p1098_p5, %p1097_p4 }
   0xe   :  { %p1100_p7 = pnand %p1099_p6, %p1093_p3 }
  0x10   :  { %1103 = shalt.err (!%p1100_p7)
}
  0x11   :  { %s1155_s22 = smov 256   ;;  %s1156_s23 = smov 16  }
  0x12   :  { %22 = dma.hbm_to_vmem [thread:$0]  %s1361_s0, 2048, %s17_s13, [#allocation3], %s1155_s22, %s1155_s22, %s1156_s23  }
  0x13   :  { %s1157_s26 = smov [#allocation5]   ;;  %s1104_s30 = scalar_lea.hbm %s1362_s1, 8192 }
  0x14   :  { %s28_s27 = sshll.u32 %s1157_s26, 4  ;;  %p1105_p8 = scmp.ne.s32.totalorder %s1362_s1, %s1104_s30  ;;  %s29_s27 = int_to_ptr.vmem [resolvable:$true] %s28_s27 }
  0x15   :  { %p1108_p9 = scmp.lt.u32.totalorder %s1104_s30, %s1362_s1 }
  0x17   :  { %p1110_p10 = pnand %p1108_p9, %p1105_p8 }
  0x19   :  { %1113 = shalt.err (!%p1110_p10)
}
  0x1a   :  { %s1114_s8 = scalar_lea.vmem %s29_s27, 8192  ;;  %p1119_p12 = scmp.lt.s32.totalorder %s29_s27, %s29_s27 }
  0x1b   :  { %p1115_p11 = scmp.ne.s32.totalorder %s29_s27, %s1114_s8  ;;  %p1120_p13 = scmp.lt.s32.totalorder %s1114_s8, %s1114_s8 }
  0x1d   :  { %p1121_p0 = por %p1120_p13, %p1119_p12 }
  0x1f   :  { %p1122_p1 = pnand %p1121_p0, %p1115_p11 }
  0x21   :  { %1125 = shalt.err (!%p1122_p1)
}
  0x22   :  { %s1158_s0 = smov 128   ;;  %s1159_s9 = smov 8  }
  0x23   :  { %34 = dma.hbm_to_vmem [thread:$0]  %s1362_s1, 8192, %s29_s27, [#allocation6], %s1158_s0, %s1158_s0, %s1159_s9  }
  0x24   :  { %1148 = dma.done.wait [#allocation3], 2048  }
  0x25   :  { %1149 = vsyncadd [#allocation3], 4294965248 }
  0x26   :  { %1150 = dma.done.wait [#allocation6], 8192  }
  0x27   :  { %1151 = vsyncadd [#allocation6], 4294959104  ;;  %v970_v0 = vld [vmem:[#allocation5 + $0x4] ss:$8 sps:$4 sm:$0xff]   ;;  %v972_v1 = vld [vmem:[#allocation5] ss:$8 sps:$4 sm:$0xff]  }
  0x28   :  { %768 = vmatprep.subr.bf16.mxu1 %v970_v0  ;;  %v973_v2 = vld [vmem:[#allocation5 + $0x104] ss:$8 sps:$4 sm:$0xff]   ;;  %v975_v3 = vld [vmem:[#allocation5 + $0x100] ss:$8 sps:$4 sm:$0xff]   ;;  %v976_v4 = vld [vmem:[#allocation5 + $0x14] ss:$8 sps:$4 sm:$0xff]  }
  0x29   :  { %770 = vmatpush1.bf16.msra.mxu1 %v972_v1  ;;  %v978_v5 = vld [vmem:[#allocation5 + $0x10] ss:$8 sps:$4 sm:$0xff]   ;;  %832 = vmatprep.subr.bf16.mxu0 %v973_v2  ;;  %v979_v6 = vld [vmem:[#allocation5 + $0x114] ss:$8 sps:$4 sm:$0xff]   ;;  %v982_v8 = vld [vmem:[#allocation5 + $0x24] ss:$8 sps:$4 sm:$0xff]  }
  0x2a   :  { %834 = vmatpush1.bf16.msra.mxu0 %v975_v3  ;;  %772 = vmatprep.subr.bf16.mxu1 %v976_v4  ;;  %v981_v7 = vld [vmem:[#allocation5 + $0x110] ss:$8 sps:$4 sm:$0xff]   ;;  %v984_v9 = vld [vmem:[#allocation5 + $0x20] ss:$8 sps:$4 sm:$0xff]   ;;  %v985_v10 = vld [vmem:[#allocation5 + $0x124] ss:$8 sps:$4 sm:$0xff]  }
  0x2b   :  { %836 = vmatprep.subr.bf16.mxu0 %v979_v6  ;;  %v988_v11 = vld [vmem:[#allocation5 + $0x34] ss:$8 sps:$4 sm:$0xff]   ;;  %v987_v12 = vld [vmem:[#allocation5 + $0x120] ss:$8 sps:$4 sm:$0xff]   ;;  %v990_v14 = vld [vmem:[#allocation5 + $0x30] ss:$8 sps:$4 sm:$0xff]  }
  0x2c   :  { %v991_v13 = vld [vmem:[#allocation5 + $0x134] ss:$8 sps:$4 sm:$0xff]   ;;  %v994_v15 = vld [vmem:[#allocation5 + $0x44] ss:$8 sps:$4 sm:$0xff]   ;;  %v993_v16 = vld [vmem:[#allocation5 + $0x130] ss:$8 sps:$4 sm:$0xff]  }
  0x2d   :  { %774 = vmatpush1.bf16.msra.mxu1 %v978_v5  ;;  %v997_v17 = vld [vmem:[#allocation5 + $0x144] ss:$8 sps:$4 sm:$0xff]   ;;  %v996_v18 = vld [vmem:[#allocation5 + $0x40] ss:$8 sps:$4 sm:$0xff]   ;;  %v1000_v19 = vld [vmem:[#allocation5 + $0x54] ss:$8 sps:$4 sm:$0xff]  }
  0x2e   :  { %776 = vmatprep.subr.bf16.mxu1 %v982_v8  ;;  %838 = vmatpush1.bf16.msra.mxu0 %v981_v7  ;;  %v999_v20 = vld [vmem:[#allocation5 + $0x140] ss:$8 sps:$4 sm:$0xff]   ;;  %v1003_v21 = vld [vmem:[#allocation5 + $0x154] ss:$8 sps:$4 sm:$0xff]   ;;  %v1002_v22 = vld [vmem:[#allocation5 + $0x50] ss:$8 sps:$4 sm:$0xff]  }
  0x2f   :  { %840 = vmatprep.subr.bf16.mxu0 %v985_v10  ;;  %v1006_v23 = vld [vmem:[#allocation5 + $0x64] ss:$8 sps:$4 sm:$0xff]   ;;  %v1005_v24 = vld [vmem:[#allocation5 + $0x150] ss:$8 sps:$4 sm:$0xff]   ;;  %v1008_v26 = vld [vmem:[#allocation5 + $0x60] ss:$8 sps:$4 sm:$0xff]  }
  0x30   :  { %v1009_v25 = vld [vmem:[#allocation5 + $0x164] ss:$8 sps:$4 sm:$0xff]   ;;  %v1012_v27 = vld [vmem:[#allocation5 + $0x74] ss:$8 sps:$4 sm:$0xff]   ;;  %v1011_v28 = vld [vmem:[#allocation5 + $0x160] ss:$8 sps:$4 sm:$0xff]  }
  0x31   :  { %778 = vmatpush1.bf16.msra.mxu1 %v984_v9  ;;  %v1015_v29 = vld [vmem:[#allocation5 + $0x174] ss:$8 sps:$4 sm:$0xff]   ;;  %v1014_v30 = vld [vmem:[#allocation5 + $0x70] ss:$8 sps:$4 sm:$0xff]   ;;  %v1018_v31 = vld [vmem:[#allocation5 + $0x84] ss:$8 sps:$4 sm:$0xff]  }
  0x32   :  { %780 = vmatprep.subr.bf16.mxu1 %v988_v11  ;;  %842 = vmatpush1.bf16.msra.mxu0 %v987_v12  ;;  %v1017_v32 = vld [vmem:[#allocation5 + $0x170] ss:$8 sps:$4 sm:$0xff]   ;;  %v1021_v33 = vld [vmem:[#allocation5 + $0x184] ss:$8 sps:$4 sm:$0xff]   ;;  %v1020_v34 = vld [vmem:[#allocation5 + $0x80] ss:$8 sps:$4 sm:$0xff]  }
  0x33   :  { %844 = vmatprep.subr.bf16.mxu0 %v991_v13  ;;  %v1024_v35 = vld [vmem:[#allocation5 + $0x94] ss:$8 sps:$4 sm:$0xff]   ;;  %v1023_v36 = vld [vmem:[#allocation5 + $0x180] ss:$8 sps:$4 sm:$0xff]   ;;  %v1026_v38 = vld [vmem:[#allocation5 + $0x90] ss:$8 sps:$4 sm:$0xff]  }
  0x34   :  { %v1027_v37 = vld [vmem:[#allocation5 + $0x194] ss:$8 sps:$4 sm:$0xff]   ;;  %v1030_v39 = vld [vmem:[#allocation5 + $0xa4] ss:$8 sps:$4 sm:$0xff]   ;;  %v1029_v40 = vld [vmem:[#allocation5 + $0x190] ss:$8 sps:$4 sm:$0xff]  }
  0x35   :  { %782 = vmatpush1.bf16.msra.mxu1 %v990_v14  ;;  %v1033_v41 = vld [vmem:[#allocation5 + $0x1a4] ss:$8 sps:$4 sm:$0xff]   ;;  %v1032_v42 = vld [vmem:[#allocation5 + $0xa0] ss:$8 sps:$4 sm:$0xff]   ;;  %v1036_v44 = vld [vmem:[#allocation5 + $0xb4] ss:$8 sps:$4 sm:$0xff]  }
  0x36   :  { %784 = vmatprep.subr.bf16.mxu1 %v994_v15  ;;  %846 = vmatpush1.bf16.msra.mxu0 %v993_v16  ;;  %v1035_v43 = vld [vmem:[#allocation5 + $0x1a0] ss:$8 sps:$4 sm:$0xff]   ;;  %vm107_vm0 = vcmask 1043456   ;;  %v1038_v45 = vld [vmem:[#allocation5 + $0xb0] ss:$8 sps:$4 sm:$0xff]   ;;  %vm568_vm1 = vcmask 1041409  }
  0x37   :  { %848 = vmatprep.subr.bf16.mxu0 %v997_v17  ;;  %v1039_v46 = vld [vmem:[#allocation5 + $0x1b4] ss:$8 sps:$4 sm:$0xff]   ;;  %v1042_v47 = vld [vmem:[#allocation5 + $0xc4] ss:$8 sps:$4 sm:$0xff]   ;;  %v1041_v61 = vld [vmem:[#allocation5 + $0x1b0] ss:$8 sps:$4 sm:$0xff]  }
  0x38   :  { %v43_v48 = vld [vmem:[#allocation2] sm:$0xff]  ;;  %v1205_v49 = vld [vmem:[#allocation2 + $0x10] sm:$0xff]  ;;  %vm570_vm2 = vcmask 1042434   ;;  %vm572_vm3 = vcmask 1043459   ;;  %vm574_vm4 = vcmask 1044484   ;;  %vm576_vm5 = vcmask 1045509  }
  0x39   :  { %786 = vmatpush1.bf16.msra.mxu1 %v996_v18  ;;  %v1207_v50 = vld [vmem:[#allocation2 + $0x20] sm:$0xff]  ;;  %v1209_v51 = vld [vmem:[#allocation2 + $0x30] sm:$0xff]  ;;  %v75_v52 = vcombine.high %v43_v48, %v43_v48  ;;  %v1212_v53 = vsel %vm107_vm0, %v43_v48, 0.0  ;;  %v77_v57 = vcombine.high %v1205_v49, %v1205_v49  ;;  %vm578_vm6 = vcmask 1046534   ;;  %s1160_s13 = smov [#allocation7]  }
  0x3a   :  { %788 = vmatprep.subr.bf16.mxu1 %v1000_v19  ;;  %850 = vmatpush1.bf16.msra.mxu0 %v999_v20  ;;  %v1214_v54 = vld [vmem:[#allocation2 + $0x40] sm:$0xff]  ;;  %v1216_v55 = vld [vmem:[#allocation2 + $0x50] sm:$0xff]  ;;  %v79_v58 = vcombine.high %v1207_v50, %v1207_v50  ;;  %v81_v59 = vcombine.high %v1209_v51, %v1209_v51  ;;  %v109_v60 = vrot.slane %v1212_v53, 4  ;;  %vm580_vm7 = vcmask 1047559   ;;  %s757_s14 = sshll.u32 %s1160_s13, 4  ;;  %s758_s14 = int_to_ptr.vmem [resolvable:$true] %s757_s14 }
  0x3b   :  { %852 = vmatprep.subr.bf16.mxu0 %v1003_v21  ;;  %v1218_v56 = vld [vmem:[#allocation2 + $0x60] sm:$0xff]  ;;  %v1227_v62 = vld [vmem:[#allocation2 + $0x70] sm:$0xff]  ;;  %v83_v63 = vcombine.high %v1214_v54, %v1214_v54  ;;  %v85_v0 = vcombine.high %v1216_v55, %v1216_v55  ;;  %v115_v2 = vsel %vm107_vm0, %v75_v52, 0.0  ;;  %v143_v6 = vsel %vm107_vm0, %v77_v57, 0.0  ;;  %s1126_s15 = scalar_lea.vmem %s758_s14, 256  ;;  %p1131_p3 = scmp.lt.s32.totalorder %s758_s14, %s758_s14 }
  0x3c   :  { %v87_v1 = vcombine.high %v1218_v56, %v1218_v56  ;;  %v1045_v3 = vld [vmem:[#allocation5 + $0x1c4] ss:$8 sps:$4 sm:$0xff]   ;;  %v89_v4 = vcombine.high %v1227_v62, %v1227_v62  ;;  %v116_v5 = vrot.slane %v115_v2, 4  ;;  %v171_v7 = vsel %vm107_vm0, %v79_v58, 0.0  ;;  %v1044_v8 = vld [vmem:[#allocation5 + $0xc0] ss:$8 sps:$4 sm:$0xff]   ;;  %p1127_p2 = scmp.ne.s32.totalorder %s758_s14, %s1126_s15  ;;  %p1132_p4 = scmp.lt.s32.totalorder %s1126_s15, %s1126_s15 }
  0x3d   :  { %790 = vmatpush1.bf16.msra.mxu1 %v1002_v22  ;;  %v144_v9 = vrot.slane %v143_v6, 4  ;;  %v172_v10 = vrot.slane %v171_v7, 4  ;;  %v199_v11 = vsel %vm107_vm0, %v81_v59, 0.0  ;;  %v227_v12 = vsel %vm107_vm0, %v83_v63, 0.0  ;;  %v1048_v13 = vld [vmem:[#allocation5 + $0xd4] ss:$8 sps:$4 sm:$0xff]  }
  0x3e   :  { %792 = vmatprep.subr.bf16.mxu1 %v1006_v23  ;;  %854 = vmatpush1.bf16.msra.mxu0 %v1005_v24  ;;  %v117_v14 = vadd.f32 %v116_v5, %v115_v2  ;;  %v200_v15 = vrot.slane %v199_v11, 4  ;;  %v228_v16 = vrot.slane %v227_v12, 4  ;;  %v255_v17 = vsel %vm107_vm0, %v85_v0, 0.0  ;;  %v1047_v18 = vld [vmem:[#allocation5 + $0x1c0] ss:$8 sps:$4 sm:$0xff]   ;;  %p1133_p5 = por %p1132_p4, %p1131_p3 }
  0x3f   :  { %856 = vmatprep.subr.bf16.mxu0 %v1009_v25  ;;  %v145_v19 = vadd.f32 %v144_v9, %v143_v6  ;;  %v173_v20 = vadd.f32 %v172_v10, %v171_v7  ;;  %v256_v21 = vrot.slane %v255_v17, 4  ;;  %v283_v22 = vsel %vm107_vm0, %v87_v1, 0.0  ;;  %v1051_v23 = vld [vmem:[#allocation5 + $0x1d4] ss:$8 sps:$4 sm:$0xff]   ;;  %v1056_v48 = vld [vmem:[#allocation5 + $0xe0] ss:$8 sps:$4 sm:$0xff]  }
  0x40   :  { %v118_v24 = vrot.slane %v117_v14, 2  ;;  %v201_v25 = vadd.f32 %v200_v15, %v199_v11  ;;  %p1134_p6 = pnand %p1133_p5, %p1127_p2 }
  0x41   :  { %794 = vmatpush1.bf16.msra.mxu1 %v1008_v26  ;;  %v229_v26 = vadd.f32 %v228_v16, %v227_v12  ;;  %v110_v12 = vadd.f32 %v109_v60, %v1212_v53  ;;  %v164_v60 = vsel %vm107_vm0, %v1207_v50, 0.0 }
  0x42   :  { %796 = vmatprep.subr.bf16.mxu1 %v1012_v27  ;;  %858 = vmatpush1.bf16.msra.mxu0 %v1011_v28  ;;  %v284_v27 = vrot.slane %v283_v22, 4  ;;  %v1050_v28 = vld [vmem:[#allocation5 + $0xd0] ss:$8 sps:$4 sm:$0xff]  }
  0x43   :  { %860 = vmatprep.subr.bf16.mxu0 %v1015_v29  ;;  %v146_v29 = vrot.slane %v145_v19, 2 }
  0x45   :  { %798 = vmatpush1.bf16.msra.mxu1 %v1014_v30  ;;  %v174_v30 = vrot.slane %v173_v20, 2 }
  0x46   :  { %800 = vmatprep.subr.bf16.mxu1 %v1018_v31  ;;  %862 = vmatpush1.bf16.msra.mxu0 %v1017_v32  ;;  %v257_v31 = vadd.f32 %v256_v21, %v255_v17  ;;  %v311_v32 = vsel %vm107_vm0, %v89_v4, 0.0  ;;  %v136_v17 = vsel %vm107_vm0, %v1205_v49, 0.0 }
  0x47   :  { %864 = vmatprep.subr.bf16.mxu0 %v1021_v33  ;;  %v1054_v33 = vld [vmem:[#allocation5 + $0xe4] ss:$8 sps:$4 sm:$0xff]   ;;  %v137_v21 = vrot.slane %v136_v17, 4 }
  0x49   :  { %802 = vmatpush1.bf16.msra.mxu1 %v1020_v34  ;;  %v119_v34 = vadd.f32 %v118_v24, %v117_v14  ;;  %v192_v24 = vsel %vm107_vm0, %v1209_v51, 0.0 }
  0x4a   :  { %804 = vmatprep.subr.bf16.mxu1 %v1024_v35  ;;  %866 = vmatpush1.bf16.msra.mxu0 %v1023_v36  ;;  %v202_v35 = vrot.slane %v201_v25, 2  ;;  %v230_v36 = vrot.slane %v229_v26, 2 }
  0x4b   :  { %868 = vmatprep.subr.bf16.mxu0 %v1027_v37  ;;  %v285_v37 = vadd.f32 %v284_v27, %v283_v22  ;;  %v1065_v22 = vld [vmem:[#allocation5 + $0x1f0] ss:$8 sps:$4 sm:$0xff]   ;;  %v165_v27 = vrot.slane %v164_v60, 4 }
  0x4d   :  { %806 = vmatpush1.bf16.msra.mxu1 %v1026_v38  ;;  %v1053_v38 = vld [vmem:[#allocation5 + $0x1d0] ss:$8 sps:$4 sm:$0xff]  }
  0x4e   :  { %808 = vmatprep.subr.bf16.mxu1 %v1030_v39  ;;  %870 = vmatpush1.bf16.msra.mxu0 %v1029_v40  ;;  %v147_v39 = vadd.f32 %v146_v29, %v145_v19  ;;  %v175_v40 = vadd.f32 %v174_v30, %v173_v20  ;;  %v111_v20 = vrot.slane %v110_v12, 2  ;;  %v193_v30 = vrot.slane %v192_v24, 4 }
  0x4f   :  { %872 = vmatprep.subr.bf16.mxu0 %v1033_v41  ;;  %v258_v41 = vrot.slane %v257_v31, 2 }
  0x50   :  { %v148_v52 = vrot.slane %v147_v39, 1  ;;  %v176_v57 = vrot.slane %v175_v40, 1 }
  0x51   :  { %810 = vmatpush1.bf16.msra.mxu1 %v1032_v42  ;;  %v312_v42 = vrot.slane %v311_v32, 4  ;;  %v259_v58 = vadd.f32 %v258_v41, %v257_v31  ;;  %v220_v31 = vsel %vm107_vm0, %v1214_v54, 0.0 }
  0x52   :  { %812 = vmatprep.subr.bf16.mxu1 %v1036_v44  ;;  %874 = vmatpush1.bf16.msra.mxu0 %v1035_v43  ;;  %v1057_v43 = vld [vmem:[#allocation5 + $0x1e4] ss:$8 sps:$4 sm:$0xff]   ;;  %v120_v44 = vrot.slane %v119_v34, 1  ;;  %v149_v4 = vadd.f32 %v148_v52, %v147_v39  ;;  %v177_v5 = vadd.f32 %v176_v57, %v175_v40 }
  0x53   :  { %876 = vmatprep.subr.bf16.mxu0 %v1039_v46  ;;  %v231_v46 = vadd.f32 %v230_v36, %v229_v26  ;;  %v313_v59 = vadd.f32 %v312_v42, %v311_v32  ;;  %v260_v6 = vrot.slane %v259_v58, 1  ;;  %v138_v26 = vadd.f32 %v137_v21, %v136_v17  ;;  %v1265_v42 = vld [vmem:[#allocation2 + $0x8] sm:$0xff]  ;;  %v1291_v21 = vld [vmem:[#allocation2 + $0x78] sm:$0xff] }
  0x54   :  { %v121_v63 = vadd.f32 %v120_v44, %v119_v34  ;;  %v166_v34 = vadd.f32 %v165_v27, %v164_v60  ;;  %v221_v36 = vrot.slane %v220_v31, 4  ;;  %v276_v44 = vsel %vm107_vm0, %v1218_v56, 0.0  ;;  %v1275_v56 = vld [vmem:[#allocation2 + $0x28] sm:$0xff] }
  0x55   :  { %814 = vmatpush1.bf16.msra.mxu1 %v1038_v45  ;;  %v203_v45 = vadd.f32 %v202_v35, %v201_v25  ;;  %v232_v1 = vrot.slane %v231_v46, 1  ;;  %v314_v7 = vrot.slane %v313_v59, 2  ;;  %v261_v14 = vadd.f32 %v260_v6, %v259_v58 }
  0x56   :  { %816 = vmatprep.subr.bf16.mxu1 %v1042_v47  ;;  %878 = vmatpush1.bf16.msra.mxu0 %v1041_v61  ;;  %v286_v47 = vrot.slane %v285_v37, 2  ;;  %v1060_v61 = vld [vmem:[#allocation5 + $0xf4] ss:$8 sps:$4 sm:$0xff]   ;;  %v582_v16 = vsel %vm568_vm1, %v149_v4, %v121_v63  ;;  %v112_v25 = vadd.f32 %v111_v20, %v110_v12  ;;  %v194_v35 = vadd.f32 %v193_v30, %v192_v24 }
  0x57   :  { %880 = vmatprep.subr.bf16.mxu0 %v1045_v3  ;;  %v204_v0 = vrot.slane %v203_v45, 1  ;;  %v1059_v3 = vld [vmem:[#allocation5 + $0x1e0] ss:$8 sps:$4 sm:$0xff]   ;;  %v233_v10 = vadd.f32 %v232_v1, %v231_v46  ;;  %v315_v15 = vadd.f32 %v314_v7, %v313_v59  ;;  %v583_v19 = vsel %vm570_vm2, %v177_v5, %v582_v16  ;;  %v1277_v5 = vld [vmem:[#allocation2 + $0x38] sm:$0xff] }
  0x58   :  { %v287_v2 = vadd.f32 %v286_v47, %v285_v37  ;;  %v113_v50 = vrot.slane %v112_v25, 1  ;;  %v248_v37 = vsel %vm107_vm0, %v1216_v55, 0.0  ;;  %v167_v40 = vrot.slane %v166_v34, 2  ;;  %v1271_v55 = vld [vmem:[#allocation2 + $0x18] sm:$0xff]  ;;  %v1286_v16 = vld [vmem:[#allocation2 + $0x68] sm:$0xff] }
  0x59   :  { %818 = vmatpush1.bf16.msra.mxu1 %v1044_v8  ;;  %v1063_v8 = vld [vmem:[#allocation5 + $0x1f4] ss:$8 sps:$4 sm:$0xff]   ;;  %v205_v9 = vadd.f32 %v204_v0, %v203_v45  ;;  %v249_v41 = vrot.slane %v248_v37, 4  ;;  %v195_v54 = vrot.slane %v194_v35, 2  ;;  %v304_v45 = vsel %vm107_vm0, %v1227_v62, 0.0 }
  0x5a   :  { %820 = vmatprep.subr.bf16.mxu1 %v1048_v13  ;;  %882 = vmatpush1.bf16.msra.mxu0 %v1047_v18  ;;  %v288_v11 = vrot.slane %v287_v2, 1  ;;  %v1062_v13 = vld [vmem:[#allocation5 + $0xf0] ss:$8 sps:$4 sm:$0xff]   ;;  %v168_v47 = vadd.f32 %v167_v40, %v166_v34  ;;  %v277_v52 = vrot.slane %v276_v44, 4  ;;  %v305_v59 = vrot.slane %v304_v45, 4 }
  0x5b   :  { %884 = vmatprep.subr.bf16.mxu0 %v1051_v23  ;;  %v316_v23 = vrot.slane %v315_v15, 1  ;;  %v584_v53 = vsel %vm572_vm3, %v205_v9, %v583_v19  ;;  %v196_v57 = vadd.f32 %v195_v54, %v194_v35  ;;  %v78_v6 = vcombine.high %v1271_v55, %v1271_v55 }
  0x5c   :  { %v289_v18 = vadd.f32 %v288_v11, %v287_v2  ;;  %v585_v49 = vsel %vm574_vm4, %v233_v10, %v584_v53  ;;  %v169_v0 = vrot.slane %v168_v47, 1  ;;  %v278_v2 = vadd.f32 %v277_v52, %v276_v44  ;;  %v1282_v11 = vld [vmem:[#allocation2 + $0x48] sm:$0xff] }
  0x5d   :  { %822 = vmatpush1.bf16.msra.mxu1 %v1050_v28  ;;  %v317_v28 = vadd.f32 %v316_v23, %v315_v15  ;;  %v586_v29 = vsel %vm576_vm5, %v261_v14, %v585_v49  ;;  %v306_v4 = vadd.f32 %v305_v59, %v304_v45  ;;  %v1284_v15 = vld [vmem:[#allocation2 + $0x58] sm:$0xff]  ;;  %v80_v17 = vcombine.high %v1275_v56, %v1275_v56 }
  0x5e   :  { %824 = vmatprep.subr.bf16.mxu1 %v1054_v33  ;;  %886 = vmatpush1.bf16.msra.mxu0 %v1053_v38  ;;  %v587_v32 = vsel %vm578_vm6, %v289_v18, %v586_v29  ;;  %v139_v33 = vrot.slane %v138_v26, 2  ;;  %v114_v38 = vadd.f32 %v113_v50, %v112_v25  ;;  %v170_v7 = vadd.f32 %v169_v0, %v168_v47 }
  0x5f   :  { %888 = vmatprep.subr.bf16.mxu0 %v1057_v43  ;;  %v588_v51 = vsel %vm580_vm7, %v317_v28, %v587_v32  ;;  %v222_v43 = vadd.f32 %v221_v36, %v220_v31  ;;  %v279_v9 = vrot.slane %v278_v2, 2  ;;  %v307_v14 = vrot.slane %v306_v4, 2 }
  0x60   :  { %671 = vmatprep.mubr.f32.mxu1 %v588_v51  ;;  %v140_v39 = vadd.f32 %v139_v33, %v138_v26  ;;  %v84_v24 = vcombine.high %v1282_v11, %v1282_v11  ;;  %v86_v26 = vcombine.high %v1284_v15, %v1284_v15  ;;  %v88_v27 = vcombine.high %v1286_v16, %v1286_v16 }
  0x61   :  { %826 = vmatpush1.bf16.msra.mxu1 %v1056_v48  ;;  %v250_v48 = vadd.f32 %v249_v41, %v248_v37  ;;  %v223_v58 = vrot.slane %v222_v43, 2  ;;  %v280_v19 = vadd.f32 %v279_v9, %v278_v2  ;;  %v308_v53 = vadd.f32 %v307_v14, %v306_v4 }
  0x62   :  { %828 = vmatprep.subr.bf16.mxu1 %v1060_v61  ;;  %890 = vmatpush1.bf16.msra.mxu0 %v1059_v3  ;;  %v141_v46 = vrot.slane %v140_v39, 1  ;;  %v76_v61 = vcombine.high %v1265_v42, %v1265_v42  ;;  %v197_v3 = vrot.slane %v196_v57, 1  ;;  %v90_v30 = vcombine.high %v1291_v21, %v1291_v21 }
  0x63   :  { %892 = vmatprep.subr.bf16.mxu0 %v1063_v8  ;;  %v251_v1 = vrot.slane %v250_v48, 2  ;;  %v224_v62 = vadd.f32 %v223_v58, %v222_v43  ;;  %v281_v25 = vrot.slane %v280_v19, 1  ;;  %v309_v28 = vrot.slane %v308_v53, 1 }
  0x64   :  { %v142_v63 = vadd.f32 %v141_v46, %v140_v39  ;;  %v198_v12 = vadd.f32 %v197_v3, %v196_v57  ;;  %v129_v31 = vsel %vm107_vm0, %v76_v61, 0.0  ;;  %v157_v34 = vsel %vm107_vm0, %v78_v6, 0.0 }
  0x65   :  { %830 = vmatpush1.bf16.msra.mxu1 %v1062_v13  ;;  %v252_v8 = vadd.f32 %v251_v1, %v250_v48  ;;  %v225_v13 = vrot.slane %v224_v62, 1  ;;  %v282_v32 = vadd.f32 %v281_v25, %v280_v19  ;;  %v130_v33 = vrot.slane %v129_v31, 4 }
  0x66   :  { %894 = vmatpush1.bf16.msra.mxu0 %v1065_v22  ;;  %v569_v10 = vsel %vm568_vm1, %v142_v63, %v114_v38  ;;  %v82_v22 = vcombine.high %v1277_v5, %v1277_v5  ;;  %v310_v51 = vadd.f32 %v309_v28, %v308_v53  ;;  %v158_v35 = vrot.slane %v157_v34, 4 }
  0x67   :  { %v253_v18 = vrot.slane %v252_v8, 1  ;;  %v571_v20 = vsel %vm570_vm2, %v170_v7, %v569_v10  ;;  %v226_v23 = vadd.f32 %v225_v13, %v224_v62  ;;  %v185_v36 = vsel %vm107_vm0, %v80_v17, 0.0 }
  0x68   :  { %v573_v60 = vsel %vm572_vm3, %v198_v12, %v571_v20  ;;  %v213_v37 = vsel %vm107_vm0, %v82_v22, 0.0  ;;  %v131_v39 = vadd.f32 %v130_v33, %v129_v31  ;;  %v186_v40 = vrot.slane %v185_v36, 4 }
  0x69   :  { %v254_v49 = vadd.f32 %v253_v18, %v252_v8  ;;  %v575_v29 = vsel %vm574_vm4, %v226_v23, %v573_v60  ;;  %v214_v41 = vrot.slane %v213_v37, 4  ;;  %v159_v43 = vadd.f32 %v158_v35, %v157_v34 }
  0x6a   :  { %v241_v44 = vsel %vm107_vm0, %v84_v24, 0.0  ;;  %v269_v45 = vsel %vm107_vm0, %v86_v26, 0.0  ;;  %v132_v46 = vrot.slane %v131_v39, 2  ;;  %v187_v47 = vadd.f32 %v186_v40, %v185_v36 }
  0x6b   :  { %v577_v50 = vsel %vm576_vm5, %v254_v49, %v575_v29  ;;  %v215_v48 = vadd.f32 %v214_v41, %v213_v37  ;;  %v242_v52 = vrot.slane %v241_v44, 4  ;;  %v160_v57 = vrot.slane %v159_v43, 2 }
  0x6c   :  { %v579_v38 = vsel %vm578_vm6, %v282_v32, %v577_v50  ;;  %v270_v58 = vrot.slane %v269_v45, 4  ;;  %v297_v59 = vsel %vm107_vm0, %v88_v27, 0.0  ;;  %v325_v61 = vsel %vm107_vm0, %v90_v30, 0.0 }
  0x6d   :  { %v581_v54 = vsel %vm580_vm7, %v310_v51, %v579_v38  ;;  %v133_v63 = vadd.f32 %v132_v46, %v131_v39  ;;  %v188_v0 = vrot.slane %v187_v47, 2  ;;  %v216_v1 = vrot.slane %v215_v48, 2 }
  0x6e   :  { %672 = vmatmul.mubr.f32.vlgmr.msra.gmra.mrb[0].mxu1 %v581_v54  ;;  %v243_v2 = vadd.f32 %v242_v52, %v241_v44  ;;  %v161_v3 = vadd.f32 %v160_v57, %v159_v43  ;;  %v271_v62 = vadd.f32 %v270_v58, %v269_v45  ;;  %v298_v4 = vrot.slane %v297_v59, 4 }
  0x6f   :  { %v326_v6 = vrot.slane %v325_v61, 4  ;;  %v134_v7 = vrot.slane %v133_v63, 1  ;;  %v189_v8 = vadd.f32 %v188_v0, %v187_v47  ;;  %v217_v9 = vadd.f32 %v216_v1, %v215_v48 }
  0x70   :  { %v244_v10 = vrot.slane %v243_v2, 2  ;;  %v162_v12 = vrot.slane %v161_v3, 1  ;;  %v272_v13 = vrot.slane %v271_v62, 2  ;;  %v299_v14 = vadd.f32 %v298_v4, %v297_v59 }
  0x71   :  { %v327_v17 = vadd.f32 %v326_v6, %v325_v61  ;;  %v135_v18 = vadd.f32 %v134_v7, %v133_v63  ;;  %v190_v19 = vrot.slane %v189_v8, 1  ;;  %v218_v20 = vrot.slane %v217_v9, 1 }
  0x72   :  { %v245_v22 = vadd.f32 %v244_v10, %v243_v2  ;;  %v163_v23 = vadd.f32 %v162_v12, %v161_v3  ;;  %v273_v53 = vadd.f32 %v272_v13, %v271_v62  ;;  %v300_v60 = vrot.slane %v299_v14, 2 }
  0x73   :  { %v328_v24 = vrot.slane %v327_v17, 2  ;;  %v191_v49 = vadd.f32 %v190_v19, %v189_v8  ;;  %v219_v25 = vadd.f32 %v218_v20, %v217_v9  ;;  %v122_v27 = vsel %vm107_vm0, %v1265_v42, 0.0 }
  0x74   :  { %v246_v26 = vrot.slane %v245_v22, 1  ;;  %v274_v28 = vrot.slane %v273_v53, 1  ;;  %v301_v29 = vadd.f32 %v300_v60, %v299_v14  ;;  %v596_v31 = vsel %vm568_vm1, %v163_v23, %v135_v18 }
  0x75   :  { %v329_v30 = vadd.f32 %v328_v24, %v327_v17  ;;  %v597_v50 = vsel %vm570_vm2, %v191_v49, %v596_v31  ;;  %v123_v33 = vrot.slane %v122_v27, 4  ;;  %v150_v34 = vsel %vm107_vm0, %v1271_v55, 0.0 }
  0x76   :  { %v247_v32 = vadd.f32 %v246_v26, %v245_v22  ;;  %v275_v51 = vadd.f32 %v274_v28, %v273_v53  ;;  %v302_v35 = vrot.slane %v301_v29, 1  ;;  %v598_v37 = vsel %vm572_vm3, %v219_v25, %v597_v50 }
  0x77   :  { %v330_v36 = vrot.slane %v329_v30, 1  ;;  %v124_v42 = vadd.f32 %v123_v33, %v122_v27  ;;  %v151_v39 = vrot.slane %v150_v34, 4  ;;  %v178_v40 = vsel %vm107_vm0, %v1275_v56, 0.0 }
  0x78   :  { %v599_v38 = vsel %vm574_vm4, %v247_v32, %v598_v37  ;;  %v303_v41 = vadd.f32 %v302_v35, %v301_v29  ;;  %v179_v44 = vrot.slane %v178_v40, 4  ;;  %v206_v55 = vsel %vm107_vm0, %v1277_v5, 0.0 }
  0x79   :  { %v331_v54 = vadd.f32 %v330_v36, %v329_v30  ;;  %v600_v43 = vsel %vm576_vm5, %v275_v51, %v599_v38  ;;  %v125_v45 = vrot.slane %v124_v42, 2  ;;  %v152_v46 = vadd.f32 %v151_v39, %v150_v34 }
  0x7a   :  { %v234_v47 = vsel %vm107_vm0, %v1282_v11, 0.0  ;;  %v601_v48 = vsel %vm578_vm6, %v303_v41, %v600_v43  ;;  %v180_v52 = vadd.f32 %v179_v44, %v178_v40  ;;  %v207_v57 = vrot.slane %v206_v55, 4  ;;  %v524_v44 = vld [vmem:[%s1363_s2] sm:$0x3] }
  0x7b   :  { %v235_v58 = vrot.slane %v234_v47, 4  ;;  %v602_v56 = vsel %vm580_vm7, %v331_v54, %v601_v48  ;;  %v126_v59 = vadd.f32 %v125_v45, %v124_v42  ;;  %v153_v61 = vrot.slane %v152_v46, 2 }
  0x7c   :  { %v262_v63 = vsel %vm107_vm0, %v1284_v15, 0.0  ;;  %742 = vmatprep.mubr.f32.mxu0 %v602_v56  ;;  %v181_v0 = vrot.slane %v180_v52, 2  ;;  %v208_v1 = vadd.f32 %v207_v57, %v206_v55  ;;  %v290_v11 = vsel %vm107_vm0, %v1286_v16, 0.0 }
  0x7d   :  { %v236_v2 = vadd.f32 %v235_v58, %v234_v47  ;;  %v263_v5 = vrot.slane %v262_v63, 4  ;;  %v127_v3 = vrot.slane %v126_v59, 1  ;;  %v154_v62 = vadd.f32 %v153_v61, %v152_v46 }
  0x7e   :  { %v318_v4 = vsel %vm107_vm0, %v1291_v21, 0.0  ;;  %v182_v6 = vadd.f32 %v181_v0, %v180_v52  ;;  %v209_v7 = vrot.slane %v208_v1, 2  ;;  %v291_v15 = vrot.slane %v290_v11, 4 }
  0x7f   :  { %v237_v8 = vrot.slane %v236_v2, 2  ;;  %v264_v9 = vadd.f32 %v263_v5, %v262_v63  ;;  %v128_v10 = vadd.f32 %v127_v3, %v126_v59  ;;  %v155_v12 = vrot.slane %v154_v62, 1 }
  0x80   :  { %v319_v13 = vrot.slane %v318_v4, 4  ;;  %v183_v14 = vrot.slane %v182_v6, 1  ;;  %v210_v17 = vadd.f32 %v209_v7, %v208_v1  ;;  %v292_v22 = vadd.f32 %v291_v15, %v290_v11 }
  0x81   :  { %v238_v18 = vadd.f32 %v237_v8, %v236_v2  ;;  %v265_v19 = vrot.slane %v264_v9, 2  ;;  %v156_v20 = vadd.f32 %v155_v12, %v154_v62  ;;  %v526_v41 = vlaneseq }
  0x82   :  { %v320_v23 = vadd.f32 %v319_v13, %v318_v4  ;;  %v184_v53 = vadd.f32 %v183_v14, %v182_v6  ;;  %v211_v16 = vrot.slane %v210_v17, 1  ;;  %v293_v21 = vrot.slane %v292_v22, 2 }
  0x83   :  { %v239_v60 = vrot.slane %v238_v18, 1  ;;  %v266_v24 = vadd.f32 %v265_v19, %v264_v9  ;;  %v589_v25 = vsel %vm568_vm1, %v156_v20, %v128_v10  ;;  %v527_v54 = vshrl.u32 %v526_v41, 7 }
  0x84   :  { %v321_v49 = vrot.slane %v320_v23, 2  ;;  %v212_v26 = vadd.f32 %v211_v16, %v210_v17  ;;  %v590_v29 = vsel %vm570_vm2, %v184_v53, %v589_v25  ;;  %v294_v30 = vadd.f32 %v293_v21, %v292_v22 }
  0x85   :  { %v240_v27 = vadd.f32 %v239_v60, %v238_v18  ;;  %v267_v28 = vrot.slane %v266_v24, 1  ;;  %v528_v43 = vsub.s32 0, %v527_v54  ;;  %v532_v45 = vsub.s32 1, %v527_v54 }
  0x86   :  { %v322_v31 = vadd.f32 %v321_v49, %v320_v23  ;;  %v591_v50 = vsel %vm572_vm3, %v212_v26, %v590_v29  ;;  %v295_v33 = vrot.slane %v294_v30, 1 }
  0x87   :  { %v268_v32 = vadd.f32 %v267_v28, %v266_v24  ;;  %v592_v51 = vsel %vm574_vm4, %v240_v27, %v591_v50  ;;  %v529_v46 = vrot.slane %v524_v44, %v528_v43  ;;  %v533_v55 = vrot.slane %v524_v44, %v532_v45 }
  0x88   :  { %v323_v34 = vrot.slane %v322_v31, 1  ;;  %v296_v36 = vadd.f32 %v295_v33, %v294_v30 }
  0x89   :  { %v593_v35 = vsel %vm576_vm5, %v268_v32, %v592_v51 }
  0x8a   :  { %v324_v37 = vadd.f32 %v323_v34, %v322_v31  ;;  %v594_v38 = vsel %vm578_vm6, %v296_v36, %v593_v35 }
  0x8c   :  { %v595_v42 = vsel %vm580_vm7, %v324_v37, %v594_v38 }
  0x8d   :  { %743 = vmatmul.mubr.f32.vlgmr.msra.gmra.mrb[0].mxu0 %v595_v42 }
 0x141   :  { %v673_v39 = vpop.f32.mrb[0].mxu1 }
 0x142   :  { %v675_v40 = vpop.f32.mrb[1].mxu1  ;;  %v674_v47 = vadd.f32 %v673_v39, %v529_v46 }
 0x143   :  { %v676_v48 = vadd.f32 %v675_v40, %v533_v55 }
 0x160   :  { %v744_v52 = vpop.f32.mrb[0].mxu0 }
 0x161   :  { %v745_v57 = vadd.f32 %v744_v52, %v674_v47  ;;  %v746_v58 = vpop.f32.mrb[1].mxu0 }
 0x162   :  { %v747_v56 = vadd.f32 %v746_v58, %v676_v48 }
 0x163   :  { %749 = vst [vmem:[#allocation7] sm:$0xff] %v745_v57 }
 0x164   :  { %750 = vst [vmem:[#allocation7 + $0x8] sm:$0xff] %v747_v56 }
 0x165   :  { %1137 = shalt.err (!%p1134_p6)
}
 0x166   :  { %s1138_s17 = scalar_lea.hbm %s1364_s3, 256 }
 0x167   :  { %p1139_p7 = scmp.ne.s32.totalorder %s1364_s3, %s1138_s17  ;;  %p1142_p8 = scmp.lt.u32.totalorder %s1138_s17, %s1364_s3 }
 0x169   :  { %p1144_p9 = pnand %p1142_p8, %p1139_p7 }
 0x16b   :  { %1147 = shalt.err (!%p1144_p9)
}
 0x16c   :  { %760 = dma.vmem_to_hbm [thread:$0]  %s758_s14, 256, %s1364_s3, [#allocation4]  }
 0x16d   :  { %1152 = dma.done.wait [#allocation4], 256  }
 0x16e   :  { %1153 = vsyncadd [#allocation4], 4294967040 }
 0x16f   :  { %764 = vsyncpa [#allocation3], 1 }
 0x170   :  { %765 = vsyncpa [#allocation6], 1 }
 0x171   :  { %766 = vsyncpa [#allocation4], 1 }

</bundles_post_ra>
